<compile_context>
chip_gen: v7x
topology: tpu7x:2x2x1
jax: 0.10.0
libtpu: 0.0.40
codegen_flags: <defaults>
</compile_context>

<pallas_src>
import functools

import jax
import jax.numpy as jnp
import numpy as np
from jax.experimental import pallas as pl
from jax.experimental.pallas import tpu as pltpu

_NEG_BIG = -1e30   # finite "-inf": avoids (-inf) - (-inf) -> NaN in the online lse
_LANES = 128


def _round_up(a: int, b: int) -> int:
    return ((a + b - 1) // b) * b


# ----------------------------- in-kernel helpers -----------------------------

def _lane_max(s):
    """(TN, TM) -> (TN, 128): per-lane max over the TM//128 vreg-column slabs.

    Slab slices are 128-lane aligned, so this is pure VPU (no XLU in the hot loop).
    """
    g = s.shape[1] // _LANES
    m = s[:, :_LANES]
    for j in range(1, g):
        m = jnp.maximum(m, s[:, j * _LANES:(j + 1) * _LANES])
    return m


def _lane_sumexp(s, m):
    """(TN, TM), (TN, 128) -> (TN, 128): sum over slabs of exp(s_slab - m)."""
    g = s.shape[1] // _LANES
    acc = jnp.exp(s[:, :_LANES] - m)
    for j in range(1, g):
        acc = acc + jnp.exp(s[:, j * _LANES:(j + 1) * _LANES] - m)
    return acc


def _merge_lanes(m_lane, l_lane):
    """Final 128 -> 1 cross-lane logsumexp merge (one XLU pass per N tile)."""
    m_row = jnp.max(m_lane, axis=1, keepdims=True)                      # (TN, 1)
    l_row = jnp.sum(l_lane * jnp.exp(m_lane - m_row), axis=1, keepdims=True)
    return m_row + jnp.log(l_row)                                       # (TN, 1)


# --------------------------------- kernels -----------------------------------

def parzen_resident_kernel(x_ref, mu_t_ref, b_ref, rowc_ref, o_ref, *, inv_sigma_sq):
    """1-D grid over N; the full (padded) mu^T / bias stay resident in VMEM."""
    cross = jnp.dot(x_ref[...], mu_t_ref[...],
                    preferred_element_type=jnp.float32)                 # (TN, TM)
    s = inv_sigma_sq * cross + b_ref[...]                               # (TN, TM)
    m_lane = _lane_max(s)                                               # VPU
    l_lane = _lane_sumexp(s, m_lane)                                    # VPU + EUP
    o_ref[...] = (_merge_lanes(m_lane, l_lane) + rowc_ref[...]).astype(o_ref.dtype)


def parzen_stream_kernel(x_ref, mu_t_ref, b_ref, rowc_ref, o_ref,
                         m_sc, l_sc, *, inv_sigma_sq):
    """2-D grid (N tiles parallel, M tiles arbitrary) with lane-parallel online LSE.

    m_sc / l_sc : (TN, 128) lane-dense running max / running scaled sum.
    """
    k = pl.program_id(1)

    @pl.when(k == 0)
    def _init():
        m_sc[...] = jnp.full_like(m_sc, _NEG_BIG)
        l_sc[...] = jnp.zeros_like(l_sc)

    cross = jnp.dot(x_ref[...], mu_t_ref[...],
                    preferred_element_type=jnp.float32)                 # (TN, TM)
    s = inv_sigma_sq * cross + b_ref[...]                               # (TN, TM)

    m_prev = m_sc[...]
    m_new = jnp.maximum(m_prev, _lane_max(s))                           # (TN, 128)
    l_sc[...] = jnp.exp(m_prev - m_new) * l_sc[...] + _lane_sumexp(s, m_new)
    m_sc[...] = m_new

    @pl.when(k == pl.num_programs(1) - 1)
    def _finalize():
        o_ref[...] = (_merge_lanes(m_sc[...], l_sc[...])
                      + rowc_ref[...]).astype(o_ref.dtype)


# --------------------------------- wrapper -----------------------------------

def parzen_forward(x, mu, sigma, *, tile_n=None, tile_m=None, mxu_dtype=None,
                   max_resident_m=2048):
    """Pallas Parzen forward. x: (N, D), mu: (M, D), sigma: python float."""
    N, D = x.shape
    M, D2 = mu.shape
    assert D == D2
    sigma = float(sigma)
    inv_sigma_sq = 1.0 / (sigma * sigma)
    # Faithful to the PyTorch module: Z uses mu.unsqueeze(0).shape[0] == 1.
    log_norm = float(-np.log(M) - np.log(sigma * np.sqrt(2.0 * np.pi)))

    # ---- N tiling: sublane multiples; prefer >= 2 tiles so v7x's 2 TCs share it.
    if tile_n is None:
        tile_n = 512
    tile_n = max(8, min(_round_up(tile_n, 8), _round_up(N, 8)))
    n_pad = _round_up(N, tile_n)
    if n_pad // tile_n < 2 and tile_n > 8:
        half = _round_up(max(8, tile_n // 2), 8)
        if _round_up(N, half) // half >= 2:
            tile_n = half
            n_pad = _round_up(N, tile_n)

    # ---- M tiling: lane multiples; mu-resident 1-D grid when padded M is small.
    m_pad_min = _round_up(M, _LANES)
    if tile_m is None:
        tile_m = m_pad_min if m_pad_min <= max_resident_m else 1024
    tile_m = max(_LANES, min(_round_up(tile_m, _LANES), m_pad_min))
    m_pad = _round_up(M, tile_m)
    mu_resident = (tile_m == m_pad)

    # ---- wrapper-side prep (hoisted out of the kernel) ----
    xf = x.astype(jnp.float32)
    x_p = x if n_pad == N else jnp.pad(x, ((0, n_pad - N), (0, 0)))
    mu_p = mu if m_pad == M else jnp.pad(mu, ((0, m_pad - M), (0, 0)))
    if mxu_dtype is not None:            # optional bf16 MXU operands (v6e/v7x)
        x_p = x_p.astype(mxu_dtype)
        mu_p = mu_p.astype(mxu_dtype)
    mu_t = mu_p.T                                                       # (D, m_pad)

    mu_f32 = mu.astype(jnp.float32)
    b = (-0.5 * inv_sigma_sq) * jnp.sum(mu_f32 * mu_f32, axis=-1)       # (M,)
    b = jnp.pad(b, (0, m_pad - M), constant_values=_NEG_BIG)            # pads -> 0 weight
    b = b.reshape(1, m_pad).astype(jnp.float32)

    # Per-row constant, always from f32 x (precision-symmetric with b even if
    # bf16 operands are fed to the MXU).
    rowc = (-0.5 * inv_sigma_sq) * jnp.sum(xf * xf, axis=-1) + log_norm  # (N,)
    rowc = jnp.pad(rowc, (0, n_pad - N)).reshape(n_pad, 1).astype(jnp.float32)

    n_tiles = n_pad // tile_n
    bytes_accessed = (x_p.size * x_p.dtype.itemsize
                      + n_tiles * mu_t.size * mu_t.dtype.itemsize
                      + b.size * 4 + rowc.size * 4 + n_pad * 4)
    cost = pl.CostEstimate(flops=2 * n_pad * m_pad * D,
                           transcendentals=n_pad * m_pad,
                           bytes_accessed=int(bytes_accessed))
    cparams = pltpu.CompilerParams(
        dimension_semantics=("parallel",) if mu_resident else ("parallel", "arbitrary"),
        vmem_limit_bytes=32 * 1024 * 1024)   # safe headroom on v5e/v6e/v7x

    if mu_resident:
        kernel = functools.partial(parzen_resident_kernel, inv_sigma_sq=inv_sigma_sq)
        grid_spec = pltpu.PrefetchScalarGridSpec(
            num_scalar_prefetch=0,
            grid=(n_tiles,),
            in_specs=[
                pl.BlockSpec((tile_n, D), lambda i: (i, 0)),    # x tile
                pl.BlockSpec((D, tile_m), lambda i: (0, 0)),    # mu^T (resident)
                pl.BlockSpec((1, tile_m), lambda i: (0, 0)),    # center bias (resident)
                pl.BlockSpec((tile_n, 1), lambda i: (i, 0)),    # row constant
            ],
            out_specs=pl.BlockSpec((tile_n, 1), lambda i: (i, 0)),
        )
    else:
        kernel = functools.partial(parzen_stream_kernel, inv_sigma_sq=inv_sigma_sq)
        grid_spec = pltpu.PrefetchScalarGridSpec(
            num_scalar_prefetch=0,
            grid=(n_tiles, m_pad // tile_m),
            in_specs=[
                pl.BlockSpec((tile_n, D), lambda i, k: (i, 0)),   # x (resident over k)
                pl.BlockSpec((D, tile_m), lambda i, k: (0, k)),   # mu^T, streamed
                pl.BlockSpec((1, tile_m), lambda i, k: (0, k)),   # bias, streamed
                pl.BlockSpec((tile_n, 1), lambda i, k: (i, 0)),   # row constant
            ],
            out_specs=pl.BlockSpec((tile_n, 1), lambda i, k: (i, 0)),
            scratch_shapes=[pltpu.VMEM((tile_n, _LANES), jnp.float32),   # m_i
                            pltpu.VMEM((tile_n, _LANES), jnp.float32)],  # l_i
        )

    out = pl.pallas_call(
        kernel,
        out_shape=jax.ShapeDtypeStruct((n_pad, 1), jnp.float32),
        grid_spec=grid_spec,
        compiler_params=cparams,
        cost_estimate=cost,
    )(x_p, mu_t, b, rowc)
    return out[:N, 0]


def parzen_reference(x, mu, sigma):
    """Pure-JAX reference matching the PyTorch module exactly."""
    a = (x[:, None, :] - mu[None, :, :]) / sigma             # (N, M, D)
    s = -0.5 * jnp.sum(a * a, axis=2)                        # (N, M)
    mx = jnp.max(s, axis=1)
    E = mx + jnp.log(jnp.mean(jnp.exp(s - mx[:, None]), axis=1))
    Z = 1.0 * jnp.log(sigma * np.sqrt(2.0 * np.pi))          # mu.unsqueeze(0).shape[0] == 1
    return E - Z


if __name__ == "__main__":
    key = jax.random.PRNGKey(0)
    kx, km, kx2, km2 = jax.random.split(key, 4)
    sigma = 0.75

    # Small shapes consistent with the module: batch N=8, centers M=16, dim D=128.
    N, M, D = 8, 16, 128
    x = jax.random.normal(kx, (N, D), dtype=jnp.float32)
    mu = jax.random.normal(km, (M, D), dtype=jnp.float32)

    out = jax.block_until_ready(parzen_forward(x, mu, sigma))     # mu-resident path
    ref = parzen_reference(x, mu, sigma)
    np.testing.assert_allclose(np.asarray(out), np.asarray(ref),
                               rtol=1e-4, atol=1e-4)

    # Multi-tile N (2 parallel N tiles) with mu resident (M=600 -> m_pad=640).
    N2, M2, D2 = 272, 600, 128
    x2 = jax.random.normal(kx2, (N2, D2), dtype=jnp.float32)
    mu2 = jax.random.normal(km2, (M2, D2), dtype=jnp.float32)
    out2 = jax.block_until_ready(parzen_forward(x2, mu2, sigma))
    ref2 = parzen_reference(x2, mu2, sigma)
    np.testing.assert_allclose(np.asarray(out2), np.asarray(ref2),
                               rtol=1e-4, atol=1e-4)

    # Force the streaming (online-LSE) kernel to exercise the 2-D grid path.
    out3 = jax.block_until_ready(parzen_forward(x2, mu2, sigma, tile_m=256))
    np.testing.assert_allclose(np.asarray(out3), np.asarray(ref2),
                               rtol=1e-4, atol=1e-4)

    print("KERNEL_OK")
</pallas_src>

<mosaic_0001>
module attributes {stable_mosaic.version = 11 : i64} {
  func.func @parzen_resident_kernel(%arg0: i32, %arg1: memref<8x128xf32, #tpu.memory_space<vmem>>, %arg2: memref<128x128xf32, #tpu.memory_space<vmem>>, %arg3: memref<1x128xf32, #tpu.memory_space<vmem>>, %arg4: memref<8x1xf32, #tpu.memory_space<vmem>>, %arg5: memref<8x1xf32, #tpu.memory_space<vmem>>) attributes {dimension_semantics = [#tpu.dimension_semantics<parallel>], iteration_bounds = array<i64: 1>, scalar_prefetch = 0 : i64, scratch_operands = 0 : i64, tpu.core_type = #tpu.core_type<tc>, window_params = [{transform_indices = @transform_0, window_bounds = array<i64: 8, 128>}, {pipeline_mode = #tpu.pipeline_mode<synchronous>, transform_indices = @transform_1, window_bounds = array<i64: 128, 128>}, {pipeline_mode = #tpu.pipeline_mode<synchronous>, transform_indices = @transform_2, window_bounds = array<i64: 1, 128>}, {transform_indices = @transform_3, window_bounds = array<i64: 8, 1>}, {transform_indices = @transform_4, window_bounds = array<i64: 8, 1>}]} {
    %c0 = arith.constant 0 : index
    %c0_0 = arith.constant 0 : index
    %0 = vector.load %arg1[%c0, %c0_0] : memref<8x128xf32, #tpu.memory_space<vmem>>, vector<8x128xf32>
    %c0_1 = arith.constant 0 : index
    %c0_2 = arith.constant 0 : index
    %1 = vector.load %arg2[%c0_1, %c0_2] : memref<128x128xf32, #tpu.memory_space<vmem>>, vector<128x128xf32>
    %cst = arith.constant dense<0.000000e+00> : vector<8x128xf32>
    %2 = tpu.matmul %0, %1, %cst {dimension_numbers = #tpu.dot_dimension_numbers<[1], [0], [0], [1], [0, 0, 1, 1], [], []>} : vector<8x128xf32>, vector<128x128xf32>, vector<8x128xf32> -> vector<8x128xf32>
    %cst_3 = arith.constant 1.77777779 : f32
    %3 = vector.broadcast %cst_3 : f32 to vector<8x128xf32>
    %4 = arith.mulf %3, %2 : vector<8x128xf32>
    %c0_4 = arith.constant 0 : index
    %c0_5 = arith.constant 0 : index
    %5 = vector.load %arg3[%c0_4, %c0_5] : memref<1x128xf32, #tpu.memory_space<vmem>>, vector<1x128xf32>
    %6 = vector.broadcast %5 : vector<1x128xf32> to vector<8x128xf32>
    %7 = arith.addf %4, %6 : vector<8x128xf32>
    %8 = arith.subf %7, %7 : vector<8x128xf32>
    %9 = math.exp %8 : vector<8x128xf32>
    %cst_6 = arith.constant dense<0xFF800000> : vector<8xf32>
    %10 = vector.multi_reduction <maximumf>, %7, %cst_6 [1] : vector<8x128xf32> to vector<8xf32>
    %11 = vector.shape_cast %10 : vector<8xf32> to vector<8x1xf32>
    %12 = vector.broadcast %11 : vector<8x1xf32> to vector<8x128xf32>
    %13 = arith.subf %7, %12 : vector<8x128xf32>
    %14 = math.exp %13 : vector<8x128xf32>
    %15 = arith.mulf %9, %14 : vector<8x128xf32>
    %cst_7 = arith.constant dense<0.000000e+00> : vector<8xf32>
    %16 = vector.multi_reduction <add>, %15, %cst_7 [1] : vector<8x128xf32> to vector<8xf32>
    %17 = vector.shape_cast %16 : vector<8xf32> to vector<8x1xf32>
    %18 = math.log %17 : vector<8x1xf32>
    %19 = arith.addf %11, %18 : vector<8x1xf32>
    %c0_8 = arith.constant 0 : index
    %c0_9 = arith.constant 0 : index
    %20 = vector.load %arg4[%c0_8, %c0_9] : memref<8x1xf32, #tpu.memory_space<vmem>>, vector<8x1xf32>
    %21 = arith.addf %19, %20 : vector<8x1xf32>
    %c0_10 = arith.constant 0 : index
    %c0_11 = arith.constant 0 : index
    %22 = vector.load %arg5[%c0_10, %c0_11] : memref<8x1xf32, #tpu.memory_space<vmem>>, vector<8x1xf32>
    tpu.vector_store %arg5[%c0_10, %c0_11], %21 {strides = array<i32>} : memref<8x1xf32, #tpu.memory_space<vmem>>, vector<8x1xf32>,
    return
  }
  func.func @transform_0(%arg0: i32) -> (i32, i32) {
    %c0_i32 = arith.constant 0 : i32
    %c0_i32_0 = arith.constant 0 : i32
    return %arg0, %c0_i32 : i32, i32
  }
  func.func @transform_1(%arg0: i32) -> (i32, i32) {
    %c0_i32 = arith.constant 0 : i32
    %c0_i32_0 = arith.constant 0 : i32
    %c0_i32_1 = arith.constant 0 : i32
    return %c0_i32, %c0_i32_0 : i32, i32
  }
  func.func @transform_2(%arg0: i32) -> (i32, i32) {
    %c0_i32 = arith.constant 0 : i32
    %c0_i32_0 = arith.constant 0 : i32
    %c0_i32_1 = arith.constant 0 : i32
    return %c0_i32, %c0_i32_0 : i32, i32
  }
  func.func @transform_3(%arg0: i32) -> (i32, i32) {
    %c0_i32 = arith.constant 0 : i32
    %c0_i32_0 = arith.constant 0 : i32
    return %arg0, %c0_i32 : i32, i32
  }
  func.func @transform_4(%arg0: i32) -> (i32, i32) {
    %c0_i32 = arith.constant 0 : i32
    %c0_i32_0 = arith.constant 0 : i32
    return %arg0, %c0_i32 : i32, i32
  }
}

</mosaic_0001>

<bundles_post_ra>
// kernel: tpu_custom_call.1
= control target key start
LH: loop header
LB: loop body
LE: loop exit
PB: predicated region body
PF: predicated region fallthrough
CT: control target
= control target key end

     0   :  { %9 = vsyncpa [#allocation3], 0  ;;  %s263_s15 = smov [#allocation2]   ;;  %s318_s0 = inlined_call_operand.vmem [shape: f32[8,128], index: 0, kind: input, shape index: {}]   ;;  %s319_s1 = inlined_call_operand.hbm [shape: f32[128,128], index: 1, kind: input, shape index: {}]   ;;  %s320_s2 = inlined_call_operand.vmem [shape: f32[1,128], index: 2, kind: input, shape index: {}]   ;;  %s321_s3 = inlined_call_operand.vmem [shape: f32[8,1], index: 3, kind: input, shape index: {}]   ;;  %s322_s4 = inlined_call_operand.vmem [shape: f32[8,1], index: 4, kind: output, shape index: {}]  }
   0x1   :  { %s17_s16 = sshll.u32 %s263_s15, 4  ;;  %s239_s19 = scalar_lea.hbm %s319_s1, 2048  ;;  %s18_s16 = int_to_ptr.vmem [resolvable:$true] %s17_s16 }
   0x2   :  { %p240_p0 = scmp.ne.s32.totalorder %s319_s1, %s239_s19  ;;  %p243_p1 = scmp.lt.u32.totalorder %s239_s19, %s319_s1 }
   0x4   :  { %p245_p2 = pnand %p243_p1, %p240_p0 }
   0x6   :  { %248 = shalt.err (!%p245_p2)
}
   0x7   :  { %s249_s24 = scalar_lea.vmem %s18_s16, 2048  ;;  %p254_p4 = scmp.lt.s32.totalorder %s18_s16, %s18_s16 }
   0x8   :  { %p250_p3 = scmp.ne.s32.totalorder %s18_s16, %s249_s24  ;;  %p255_p5 = scmp.lt.s32.totalorder %s249_s24, %s249_s24 }
   0xa   :  { %p256_p6 = por %p255_p5, %p254_p4 }
   0xc   :  { %p257_p7 = pnand %p256_p6, %p250_p3 }
   0xe   :  { %260 = shalt.err (!%p257_p7)
}
   0xf   :  { %s264_s25 = smov 128   ;;  %s265_s26 = smov 8  }
  0x10   :  { %23 = dma.hbm_to_vmem [thread:$0]  %s319_s1, 2048, %s18_s16, [#allocation3], %s264_s25, %s264_s25, %s265_s26  }
  0x11   :  { %261 = dma.done.wait [#allocation3], 2048  }
  0x12   :  { %262 = vsyncadd [#allocation3], 4294965248  ;;  %v266_v0 = vmov 0.0|0.0   ;;  %vm267_vm0 = vmmov 0   ;;  %v268_v1 = vmov 0.0   ;;  %v32_v2 = vld [vmem:[#allocation2] sm:$0xff] }
  0x13   :  { %203 = vmatprep.subr.bf16.mxu0 %v266_v0  ;;  %200 = vmatprep.mubr.msk.f32.mxu0 %vm267_vm0, %v268_v1  ;;  %v33_v3 = vld [vmem:[#allocation2 + $0x8] sm:$0xff]  ;;  %v34_v4 = vld [vmem:[#allocation2 + $0x10] sm:$0xff]  ;;  %v35_v6 = vld [vmem:[#allocation2 + $0x18] sm:$0xff]  ;;  %vm143_vm1 = vcmask 7168  }
  0x14   :  { %v204_v5 = vpack.c.bf16 %v33_v3, %v32_v2  ;;  %v207_v7 = vpack.c.bf16 %v35_v6, %v34_v4  ;;  %v36_v8 = vld [vmem:[#allocation2 + $0x20] sm:$0xff]  ;;  %v37_v9 = vld [vmem:[#allocation2 + $0x28] sm:$0xff]  ;;  %v38_v11 = vld [vmem:[#allocation2 + $0x30] sm:$0xff] }
  0x15   :  { %v210_v10 = vpack.c.bf16 %v37_v9, %v36_v8  ;;  %v39_v12 = vld [vmem:[#allocation2 + $0x38] sm:$0xff]  ;;  %v40_v14 = vld [vmem:[#allocation2 + $0x40] sm:$0xff]  ;;  %v41_v15 = vld [vmem:[#allocation2 + $0x48] sm:$0xff] }
  0x16   :  { %205 = vmatpush3.bf16.msra.mxu0 %v204_v5  ;;  %v213_v13 = vpack.c.bf16 %v39_v12, %v38_v11  ;;  %v216_v16 = vpack.c.bf16 %v41_v15, %v40_v14  ;;  %v42_v17 = vld [vmem:[#allocation2 + $0x50] sm:$0xff]  ;;  %v43_v18 = vld [vmem:[#allocation2 + $0x58] sm:$0xff]  ;;  %v44_v20 = vld [vmem:[#allocation2 + $0x60] sm:$0xff] }
  0x17   :  { %206 = vmatprep.subr.bf16.mxu0 %v266_v0  ;;  %v219_v19 = vpack.c.bf16 %v43_v18, %v42_v17  ;;  %v45_v21 = vld [vmem:[#allocation2 + $0x68] sm:$0xff]  ;;  %v46_v23 = vld [vmem:[#allocation2 + $0x70] sm:$0xff]  ;;  %v47_v24 = vld [vmem:[#allocation2 + $0x78] sm:$0xff] }
  0x18   :  { %v222_v22 = vpack.c.bf16 %v45_v21, %v44_v20  ;;  %v225_v25 = vpack.c.bf16 %v47_v24, %v46_v23  ;;  %v31_v26 = vld [vmem:[%s318_s0] sm:$0xff] }
  0x19   :  { %v150_v28 = vld [vmem:[%s320_s2] ss:$0 sm:$0xff] }
  0x1a   :  { %208 = vmatpush3.bf16.msra.mxu0 %v207_v7  ;;  %v141_v43 = vld [vmem:[%s321_s3] sm:$0xff] }
  0x1b   :  { %209 = vmatprep.subr.bf16.mxu0 %v266_v0 }
  0x1e   :  { %211 = vmatpush3.bf16.msra.mxu0 %v210_v10 }
  0x1f   :  { %212 = vmatprep.subr.bf16.mxu0 %v266_v0 }
  0x22   :  { %214 = vmatpush3.bf16.msra.mxu0 %v213_v13 }
  0x23   :  { %215 = vmatprep.subr.bf16.mxu0 %v266_v0 }
  0x26   :  { %217 = vmatpush3.bf16.msra.mxu0 %v216_v16 }
  0x27   :  { %218 = vmatprep.subr.bf16.mxu0 %v266_v0 }
  0x2a   :  { %220 = vmatpush3.bf16.msra.mxu0 %v219_v19 }
  0x2b   :  { %221 = vmatprep.subr.bf16.mxu0 %v266_v0 }
  0x2e   :  { %223 = vmatpush3.bf16.msra.mxu0 %v222_v22 }
  0x2f   :  { %224 = vmatprep.subr.bf16.mxu0 %v266_v0 }
  0x32   :  { %226 = vmatpush3.bf16.msra.mxu0 %v225_v25 }
  0x35   :  { %201 = vmatmul.mubr.f32.vlgmr.msra.gmra.mrb[0].mxu0 %v31_v26 }
 0x108   :  { %v114_v27 = vpop.f32.mrb[0].mxu0 }
 0x109   :  { %v118_v29 = vmul.f32 1.7777778, %v114_v27  ;;  %v202_v30 = vpop.f32.mrb[1].mxu0 }
 0x10b   :  { %v126_v31 = vadd.f32 %v150_v28, %v118_v29 }
 0x10d   :  { %130 = vmax.xlane.f32.xlu0 %v126_v31  ;;  %v127_v32 = vsub.f32 %v126_v31, %v126_v31 }
 0x10f   :  { %v128_v33 = vmul.f32 1.442695, %v127_v32 }
 0x111   :  { %233 = vpow2.f32 %v128_v33 }
 0x11b   :  { %v234_v37 = vpop.eup %233 }
 0x19a   :  { %v131_v34 = vpop.xlane.xlu0 %130 }
 0x19b   :  { %v132_v35 = vsub.f32 %v126_v31, %v131_v34 }
 0x19d   :  { %v133_v36 = vmul.f32 1.442695, %v132_v35 }
 0x19f   :  { %235 = vpow2.f32 %v133_v36 }
 0x1a9   :  { %v236_v38 = vpop.eup %235 }
 0x1aa   :  { %v135_v39 = vmul.f32 %v236_v38, %v234_v37 }
 0x1ac   :  { %136 = vadd.xlane.f32.xlu0 %v135_v39 }
 0x239   :  { %v137_v40 = vpop.xlane.xlu0 %136 }
 0x23a   :  { %237 = vlog2.f32 %v137_v40 }
 0x244   :  { %v238_v41 = vpop.eup %237 }
 0x245   :  { %v139_v42 = vmul.f32 0.6931472, %v238_v41 }
 0x247   :  { %v140_v44 = vadd.f32 %v139_v42, %v131_v34 }
 0x249   :  { %v142_v45 = vadd.f32 %v141_v43, %v140_v44 }
 0x24b   :  { %144 = vst.msk [vmem:[%s322_s4] sm:$0xff] %vm143_vm1, %v142_v45 }
 0x24c   :  { %149 = vsyncpa [#allocation3], 1 }

</bundles_post_ra>
